<compile_context>
chip_gen: v6e
topology: v6e:2x2x1
jax: 0.10.0
libtpu: 0.0.40
codegen_flags: <defaults>
</compile_context>

<pallas_src>
import jax
import jax.numpy as jnp
from jax.experimental import pallas as pl
from jax.experimental.pallas import tpu as pltpu

COLLAPSE_THRESHOLD = 0.29514
SHARPNESS = 25.0
LN_EPS = 1e-5


def _ignition_kernel(latent_ref, comb_ref, scal_ref, out_ref):
    # latent_ref: (bt, tT, D)  raw latent tile (any float dtype)
    # comb_ref:   (bt, 3, D)   rows: [lnl_w*int_p, lnl_w*wg, ones]      (f32)
    # scal_ref:   (bt, 1, 4)   cols: [S0, C0, S1, C1 + gate_bias]       (f32)
    # out_ref:    (bt, 1, tT)  ignition tile                            (f32)
    lat = latent_ref[...]
    if lat.dtype != jnp.float32:
        lat = lat.astype(jnp.float32)
    D = lat.shape[-1]

    # One fused contraction over D (big latent tile vs tiny stationary comb):
    #   ch0 -> sum(lat * lnl_w*int_p), ch1 -> sum(lat * lnl_w*wg), ch2 -> row sum.
    raw = jnp.einsum('bkd,btd->bkt', comb_ref[...], lat,
                     preferred_element_type=jnp.float32)          # (bt, 3, tT)
    sq = jnp.sum(lat * lat, axis=-1)                              # (bt, tT)

    inv_d = 1.0 / D
    mu = raw[:, 2, :] * inv_d                                     # (bt, tT)
    var = sq * inv_d - mu * mu                                    # E[x^2]-E[x]^2
    rstd = jax.lax.rsqrt(var + LN_EPS)

    scal = scal_ref[...]                                          # (bt, 1, 4)
    s0 = scal[:, :, 0]                                            # (bt, 1)
    c0 = scal[:, :, 1]
    s1 = scal[:, :, 2]
    c1b = scal[:, :, 3]

    alignment = rstd * (raw[:, 0, :] - mu * s0) + c0              # (bt, tT)
    cond_lin = rstd * (raw[:, 1, :] - mu * s1) + c1b              # (bt, tT)

    pressure = jax.nn.sigmoid((alignment - COLLAPSE_THRESHOLD) * SHARPNESS)
    conductance = jax.nn.sigmoid(cond_lin)
    out_ref[...] = (pressure * conductance)[:, None, :].astype(out_ref.dtype)


def _vmem_config():
    """(tile byte target, vmem_limit_bytes) tuned per TPU generation."""
    try:
        kind = jax.devices()[0].device_kind.lower()
    except Exception:
        kind = ""
    if "v6" in kind:                                   # v6e: 128 MiB physical VMEM
        return 12 << 20, 80 << 20
    if "v5 lite" in kind or "v5e" in kind or "v5lite" in kind:
        return 3 << 20, 40 << 20                       # v5e: raise 16 MiB scoped default
    if "v7" in kind or "7x" in kind:                   # v7x: 64 MiB per TensorCore
        return 6 << 20, 44 << 20
    return 4 << 20, 40 << 20                           # v4/v5p/unknown: conservative


def _choose_tiles(B, T, D, itemsize, target_bytes):
    """Pick (bt, tT).  tT is a multiple of 128 or the full T (lane-dense
    output + (8,128) rule); bt is unconstrained because no block places it in
    the minor-two dims."""
    row_bytes = max(1, D * itemsize)
    rows_budget = max(8, target_bytes // row_bytes)    # (b,t) rows per tile
    if T <= rows_budget:
        tT = T
        bt = int(min(B, max(1, rows_budget // T)))
    else:
        bt = 1
        tT = int(max(128, (rows_budget // 128) * 128))
        if tT >= T:
            tT = T
    # v7x megacore: make sure there is more than one grid step when possible.
    if pl.cdiv(B, bt) * pl.cdiv(T, tT) == 1 and B >= 2:
        bt = (B + 1) // 2
    return bt, tT


def resonant_ignition(latent, intent, params):
    """latent: [B, T, D], intent: [B, D] -> ignition [B, T, 1] float32."""
    B, T, D = latent.shape
    f32 = jnp.float32

    lnl_w = params["lnl_w"].reshape(D).astype(f32)
    lnl_b = params["lnl_b"].reshape(D).astype(f32)
    lni_w = params["lni_w"].reshape(D).astype(f32)
    lni_b = params["lni_b"].reshape(D).astype(f32)
    wp = params["wp"].astype(f32)                      # (D, D) torch layout (out, in)
    bp = params["bp"].reshape(1, D).astype(f32)
    wg = params["wg"].reshape(D).astype(f32)           # Linear(D, 1) weight
    bg = params["bg"].reshape(()).astype(f32)

    # Hoisted to XLA: intent LayerNorm + Linear(D,D) as one batched matmul
    # (the DxD weight never enters the kernel / VMEM).
    x = intent.astype(f32)
    mu_i = jnp.mean(x, axis=-1, keepdims=True)
    var_i = jnp.mean((x - mu_i) ** 2, axis=-1, keepdims=True)
    int_n = (x - mu_i) * jax.lax.rsqrt(var_i + LN_EPS) * lni_w + lni_b
    int_p = int_n @ wp.T + bp                          # (B, D)

    # LayerNorm fold: latent-LN affine + centering folded into contraction
    # weights and per-batch scalars (see kernel header).
    w_intp = int_p * lnl_w                             # (B, D)
    w_wg = lnl_w * wg                                  # (D,)
    comb = jnp.concatenate(
        [w_intp[:, None, :],
         jnp.broadcast_to(w_wg[None, None, :], (B, 1, D)),
         jnp.ones((B, 1, D), f32)], axis=1)            # (B, 3, D)

    S0 = jnp.sum(w_intp, axis=-1)                      # (B,)
    C0 = int_p @ lnl_b                                 # (B,)
    S1 = jnp.sum(w_wg)                                 # scalar
    C1b = jnp.dot(lnl_b, wg) + bg                      # scalar (incl. gate bias)
    scal = jnp.stack(
        [S0, C0, jnp.broadcast_to(S1, (B,)), jnp.broadcast_to(C1b, (B,))],
        axis=-1).reshape(B, 1, 4)                      # (B, 1, 4)

    target_bytes, vmem_limit = _vmem_config()
    bt, tT = _choose_tiles(B, T, D, latent.dtype.itemsize, target_bytes)
    nb, nt = pl.cdiv(B, bt), pl.cdiv(T, tT)

    cost = pl.CostEstimate(
        flops=int(B * T * (8 * D + 16)),
        transcendentals=int(3 * B * T),                # rsqrt + 2 sigmoids
        bytes_accessed=int(latent.size * latent.dtype.itemsize
                           + comb.size * 4 + scal.size * 4 + B * T * 4),
    )

    out = pl.pallas_call(
        _ignition_kernel,
        out_shape=jax.ShapeDtypeStruct((B, 1, T), f32),
        grid_spec=pltpu.PrefetchScalarGridSpec(
            num_scalar_prefetch=0,
            grid=(nb, nt),
            in_specs=[
                pl.BlockSpec((bt, tT, D), lambda i, j: (i, j, 0)),   # latent tile
                pl.BlockSpec((bt, 3, D), lambda i, j: (i, 0, 0)),    # folded weights
                pl.BlockSpec((bt, 1, 4), lambda i, j: (i, 0, 0)),    # per-batch scalars
            ],
            out_specs=pl.BlockSpec((bt, 1, tT), lambda i, j: (i, 0, j)),
        ),
        compiler_params=pltpu.CompilerParams(
            dimension_semantics=("parallel", "parallel"),
            vmem_limit_bytes=vmem_limit),
        cost_estimate=cost,
    )(latent, comb, scal)

    return out.reshape(B, T, 1)


def _reference(latent, intent, params):
    """Pure-JAX reference mirroring the PyTorch forward."""
    def ln(x, w, b):
        mu = jnp.mean(x, axis=-1, keepdims=True)
        var = jnp.mean((x - mu) ** 2, axis=-1, keepdims=True)
        return (x - mu) / jnp.sqrt(var + LN_EPS) * w + b

    lat = ln(latent, params["lnl_w"], params["lnl_b"])
    it = ln(intent, params["lni_w"], params["lni_b"])
    it = it @ params["wp"].T + params["bp"]                    # [B, D]
    it = it[:, None, :]                                        # [B, 1, D]
    alignment = jnp.sum(lat * it, axis=-1, keepdims=True)
    pressure = jax.nn.sigmoid((alignment - COLLAPSE_THRESHOLD) * SHARPNESS)
    conductance = jax.nn.sigmoid(lat @ params["wg"].T + params["bg"])
    return pressure * conductance


def make_params(key, dim):
    ks = jax.random.split(key, 6)
    scale = 1.0 / jnp.sqrt(dim)
    return {
        "lnl_w": jnp.ones((dim,), jnp.float32),
        "lnl_b": jnp.zeros((dim,), jnp.float32),
        "lni_w": jnp.ones((dim,), jnp.float32),
        "lni_b": jnp.zeros((dim,), jnp.float32),
        "wp": jax.random.uniform(ks[0], (dim, dim), jnp.float32, -scale, scale),
        "bp": jax.random.uniform(ks[1], (dim,), jnp.float32, -scale, scale),
        "wg": jax.random.uniform(ks[2], (1, dim), jnp.float32, -scale, scale),
        "bg": jax.random.uniform(ks[3], (1,), jnp.float32, -scale, scale),
    }


def _run_case(key, B, T, D):
    k_lat, k_int, k_par = jax.random.split(key, 3)
    latent = jax.random.normal(k_lat, (B, T, D), jnp.float32)
    intent = jax.random.normal(k_int, (B, D), jnp.float32)
    params = make_params(k_par, D)

    out = resonant_ignition(latent, intent, params)
    out = jax.block_until_ready(out)

    ref = _reference(latent, intent, params)
    assert out.shape == (B, T, 1), out.shape
    # E[x^2]-E[x]^2 variance form is slightly less stable than the centered
    # form; 1e-4 covers the sharpness=25 amplification at f32.
    assert jnp.allclose(out, ref, atol=1e-4, rtol=1e-4), "mismatch vs reference"


if __name__ == "__main__":
    key = jax.random.PRNGKey(0)
    k0, k1 = jax.random.split(key, 2)
    _run_case(k0, B=2, T=8, D=32)        # module-sized toy shape
    _run_case(k1, B=4, T=256, D=128)     # exercises the T-tiled / multi-step path
    print("KERNEL_OK")
</pallas_src>

<mosaic_0001>
module attributes {stable_mosaic.version = 11 : i64} {
  func.func @_ignition_kernel(%arg0: i32, %arg1: i32, %arg2: memref<1x8x32xf32, #tpu.memory_space<vmem>>, %arg3: memref<1x3x32xf32, #tpu.memory_space<vmem>>, %arg4: memref<1x1x4xf32, #tpu.memory_space<vmem>>, %arg5: memref<1x1x8xf32, #tpu.memory_space<vmem>>) attributes {dimension_semantics = [#tpu.dimension_semantics<parallel>, #tpu.dimension_semantics<parallel>], iteration_bounds = array<i64: 2, 1>, scalar_prefetch = 0 : i64, scratch_operands = 0 : i64, tpu.core_type = #tpu.core_type<tc>, window_params = [{transform_indices = @transform_0, window_bounds = array<i64: 1, 8, 32>}, {transform_indices = @transform_1, window_bounds = array<i64: 1, 3, 32>}, {transform_indices = @transform_2, window_bounds = array<i64: 1, 1, 4>}, {transform_indices = @transform_3, window_bounds = array<i64: 1, 1, 8>}]} {
    %c0 = arith.constant 0 : index
    %c0_0 = arith.constant 0 : index
    %c0_1 = arith.constant 0 : index
    %0 = vector.load %arg2[%c0, %c0_0, %c0_1] : memref<1x8x32xf32, #tpu.memory_space<vmem>>, vector<1x8x32xf32>
    %c0_2 = arith.constant 0 : index
    %c0_3 = arith.constant 0 : index
    %c0_4 = arith.constant 0 : index
    %1 = vector.load %arg3[%c0_2, %c0_3, %c0_4] : memref<1x3x32xf32, #tpu.memory_space<vmem>>, vector<1x3x32xf32>
    "tpu.trace_start"() <{level = 10 : i32, message = "bkd,btd->bkt"}> : () -> ()
    %cst = arith.constant dense<0.000000e+00> : vector<1x3x8xf32>
    %2 = tpu.matmul %1, %0, %cst {dimension_numbers = #tpu.dot_dimension_numbers<[2], [2], [1], [1], [0, 0, 0, 1, 1, 1], [0], [0]>} : vector<1x3x32xf32>, vector<1x8x32xf32>, vector<1x3x8xf32> -> vector<1x3x8xf32>
    "tpu.trace_stop"() : () -> ()
    %3 = arith.mulf %0, %0 : vector<1x8x32xf32>
    %cst_5 = arith.constant dense<0.000000e+00> : vector<1x8xf32>
    %4 = vector.multi_reduction <add>, %3, %cst_5 [2] : vector<1x8x32xf32> to vector<1x8xf32>
    %5 = vector.extract_strided_slice %2 {offsets = [0, 2, 0], sizes = [1, 1, 8], strides = [1, 1, 1]} : vector<1x3x8xf32> to vector<1x1x8xf32>
    %6 = vector.shape_cast %5 : vector<1x1x8xf32> to vector<1x8xf32>
    %cst_6 = arith.constant 3.125000e-02 : f32
    %7 = vector.broadcast %cst_6 : f32 to vector<1x8xf32>
    %8 = arith.mulf %6, %7 : vector<1x8xf32>
    %cst_7 = arith.constant 3.125000e-02 : f32
    %9 = vector.broadcast %cst_7 : f32 to vector<1x8xf32>
    %10 = arith.mulf %4, %9 : vector<1x8xf32>
    %11 = arith.mulf %8, %8 : vector<1x8xf32>
    %12 = arith.subf %10, %11 : vector<1x8xf32>
    %cst_8 = arith.constant 9.99999974E-6 : f32
    %13 = vector.broadcast %cst_8 : f32 to vector<1x8xf32>
    %14 = arith.addf %12, %13 : vector<1x8xf32>
    %15 = math.rsqrt %14 : vector<1x8xf32>
    %c0_9 = arith.constant 0 : index
    %c0_10 = arith.constant 0 : index
    %c0_11 = arith.constant 0 : index
    %16 = vector.load %arg4[%c0_9, %c0_10, %c0_11] : memref<1x1x4xf32, #tpu.memory_space<vmem>>, vector<1x1x4xf32>
    %17 = vector.extract_strided_slice %16 {offsets = [0, 0, 0], sizes = [1, 1, 1], strides = [1, 1, 1]} : vector<1x1x4xf32> to vector<1x1x1xf32>
    %18 = vector.shape_cast %17 : vector<1x1x1xf32> to vector<1x1xf32>
    %19 = vector.extract_strided_slice %16 {offsets = [0, 0, 1], sizes = [1, 1, 1], strides = [1, 1, 1]} : vector<1x1x4xf32> to vector<1x1x1xf32>
    %20 = vector.shape_cast %19 : vector<1x1x1xf32> to vector<1x1xf32>
    %21 = vector.extract_strided_slice %16 {offsets = [0, 0, 2], sizes = [1, 1, 1], strides = [1, 1, 1]} : vector<1x1x4xf32> to vector<1x1x1xf32>
    %22 = vector.shape_cast %21 : vector<1x1x1xf32> to vector<1x1xf32>
    %23 = vector.extract_strided_slice %16 {offsets = [0, 0, 3], sizes = [1, 1, 1], strides = [1, 1, 1]} : vector<1x1x4xf32> to vector<1x1x1xf32>
    %24 = vector.shape_cast %23 : vector<1x1x1xf32> to vector<1x1xf32>
    %25 = vector.extract_strided_slice %2 {offsets = [0, 0, 0], sizes = [1, 1, 8], strides = [1, 1, 1]} : vector<1x3x8xf32> to vector<1x1x8xf32>
    %26 = vector.shape_cast %25 : vector<1x1x8xf32> to vector<1x8xf32>
    %27 = vector.broadcast %18 : vector<1x1xf32> to vector<1x8xf32>
    %28 = arith.mulf %8, %27 : vector<1x8xf32>
    %29 = arith.subf %26, %28 : vector<1x8xf32>
    %30 = arith.mulf %15, %29 : vector<1x8xf32>
    %31 = vector.broadcast %20 : vector<1x1xf32> to vector<1x8xf32>
    %32 = arith.addf %30, %31 : vector<1x8xf32>
    %33 = vector.extract_strided_slice %2 {offsets = [0, 1, 0], sizes = [1, 1, 8], strides = [1, 1, 1]} : vector<1x3x8xf32> to vector<1x1x8xf32>
    %34 = vector.shape_cast %33 : vector<1x1x8xf32> to vector<1x8xf32>
    %35 = vector.broadcast %22 : vector<1x1xf32> to vector<1x8xf32>
    %36 = arith.mulf %8, %35 : vector<1x8xf32>
    %37 = arith.subf %34, %36 : vector<1x8xf32>
    %38 = arith.mulf %15, %37 : vector<1x8xf32>
    %39 = vector.broadcast %24 : vector<1x1xf32> to vector<1x8xf32>
    %40 = arith.addf %38, %39 : vector<1x8xf32>
    %cst_12 = arith.constant 2.951400e-01 : f32
    %41 = vector.broadcast %cst_12 : f32 to vector<1x8xf32>
    %42 = arith.subf %32, %41 : vector<1x8xf32>
    %cst_13 = arith.constant 2.500000e+01 : f32
    %43 = vector.broadcast %cst_13 : f32 to vector<1x8xf32>
    %44 = arith.mulf %42, %43 : vector<1x8xf32>
    %45 = arith.negf %44 : vector<1x8xf32>
    %46 = math.exp %45 : vector<1x8xf32>
    %cst_14 = arith.constant 1.000000e+00 : f32
    %47 = vector.broadcast %cst_14 : f32 to vector<1x8xf32>
    %48 = arith.addf %47, %46 : vector<1x8xf32>
    %49 = arith.divf %47, %48 : vector<1x8xf32>
    %50 = arith.negf %40 : vector<1x8xf32>
    %51 = math.exp %50 : vector<1x8xf32>
    %cst_15 = arith.constant 1.000000e+00 : f32
    %52 = vector.broadcast %cst_15 : f32 to vector<1x8xf32>
    %53 = arith.addf %52, %51 : vector<1x8xf32>
    %54 = arith.divf %52, %53 : vector<1x8xf32>
    %55 = arith.mulf %49, %54 : vector<1x8xf32>
    %56 = vector.shape_cast %55 : vector<1x8xf32> to vector<1x1x8xf32>
    %c0_16 = arith.constant 0 : index
    %c0_17 = arith.constant 0 : index
    %c0_18 = arith.constant 0 : index
    %57 = vector.load %arg5[%c0_16, %c0_17, %c0_18] : memref<1x1x8xf32, #tpu.memory_space<vmem>>, vector<1x1x8xf32>
    tpu.vector_store %arg5[%c0_16, %c0_17, %c0_18], %56 {strides = array<i32>} : memref<1x1x8xf32, #tpu.memory_space<vmem>>, vector<1x1x8xf32>,
    return
  }
  func.func @transform_0(%arg0: i32, %arg1: i32) -> (i32, i32, i32) {
    %c0_i32 = arith.constant 0 : i32
    %c0_i32_0 = arith.constant 0 : i32
    return %arg0, %arg1, %c0_i32 : i32, i32, i32
  }
  func.func @transform_1(%arg0: i32, %arg1: i32) -> (i32, i32, i32) {
    %c0_i32 = arith.constant 0 : i32
    %c0_i32_0 = arith.constant 0 : i32
    %c0_i32_1 = arith.constant 0 : i32
    return %arg0, %c0_i32, %c0_i32_0 : i32, i32, i32
  }
  func.func @transform_2(%arg0: i32, %arg1: i32) -> (i32, i32, i32) {
    %c0_i32 = arith.constant 0 : i32
    %c0_i32_0 = arith.constant 0 : i32
    %c0_i32_1 = arith.constant 0 : i32
    return %arg0, %c0_i32, %c0_i32_0 : i32, i32, i32
  }
  func.func @transform_3(%arg0: i32, %arg1: i32) -> (i32, i32, i32) {
    %c0_i32 = arith.constant 0 : i32
    %c0_i32_0 = arith.constant 0 : i32
    return %arg0, %c0_i32, %arg1 : i32, i32, i32
  }
}

</mosaic_0001>

<bundles_post_ra>
// kernel: tpu_custom_call.1
= control target key start
LH: loop header
LB: loop body
LE: loop exit
PB: predicated region body
PF: predicated region fallthrough
CT: control target
= control target key end

     0   :  { %8 = vsyncpa [#allocation3], 0  ;;  %s930_s0 = inlined_call_operand.hbm [shape: f32[2,8,32], index: 0, kind: input, shape index: {}]   ;;  %s931_s1 = inlined_call_operand.vmem [shape: f32[2,3,32], index: 1, kind: input, shape index: {}]   ;;  %s932_s2 = inlined_call_operand.vmem [shape: f32[2,1,4], index: 2, kind: input, shape index: {}]   ;;  %s933_s3 = inlined_call_operand.hbm [shape: f32[2,1,8], index: 3, kind: output, shape index: {}]  }
   0x1   :  { %10 = vsyncpa [#allocation3 + $0x1], 0 }
   0x2   :  { %11 = vsyncpa [#allocation4], 0 }
   0x3   :  { %13 = vsyncpa [#allocation4 + $0x1], 0  ;;  %s781_s12 = smov 0   ;;  %s783_s13 = smov 0  }
   0x4   :  { %s785_s14 = smov 0   ;;  %s787_s15 = smov 0  }
   0x5   :  { %s789_s16 = smov 0   ;;  %s791_s17 = smov 0  }
   0x6 LB: > { %s536_s18 = sadd.s32 4294967295, %s751_s17   ;;  %s537_s19 = sadd.s32 4294967294, %s751_s17   ;;  %s751_s17 = sphi %s791_s17, %s19_s17   ;;  %s747_s16 = sphi %s789_s16, %s945_s16   ;;  %s743_s15 = sphi %s787_s15, %s944_s15   ;;  %s739_s14 = sphi %s785_s14, %s943_s14   ;;  %s735_s13 = sphi %s783_s13, %s942_s13   ;;  %s731_s12 = sphi %s781_s12, %s941_s12  }
   0x7   : > { %s31_s20 = sadd.s32 1, %s747_s16  ;;  %s40_s21 = sadd.s32 1, %s739_s14 }
   0x8   : > { %p33_p0 = scmp.ge.s32.totalorder %s31_s20, 2  ;;  %p47_p1 = scmp.ne.s32.totalorder %s739_s14, %s735_s13 }
   0x9   : > { %p48_p2 = scmp.eq.s32.totalorder %s751_s17, 0  ;;  %p53_p3 = scmp.ne.s32.totalorder %s735_s13, %s731_s12 }
   0xa   : > { %s947_s20 = smov (%p33_p0, %s31_s20), 0  ;;  %p54_p5 = scmp.eq.s32.totalorder %s536_s18, 0 }
   0xb   : > { %p822_p4 = por %p48_p2, %p47_p1  ;;  %s35_s23 = ssub.s32 %s747_s16, %s947_s20 }
   0xc   : > { %p131_p6 = scmp.eq.s32.totalorder %s536_s18, 1  ;;  %p38_p7 = scmp.eq.s32.totalorder %s35_s23, 0 }
   0xd   : > { %p828_p8 = por %p54_p5, %p53_p3  ;;  %p137_p10 = scmp.eq.s32.totalorder %s537_s19, 1 }
   0xe   : > { %p832_p9 = por %p131_p6, %p47_p1  ;;  %p572_p13 = scmp.lt.s32.totalorder %s751_s17, 2 }
   0xf   : > { %s837_s26 = scalar_select %p38_p7, %s739_s14, %s40_s21  }
  0x10   : > { %p839_p11 = por %p137_p10, %p53_p3  ;;  %s157_s28 = sand.u32 1, %s739_s14  }
  0x11   : > { %s540_s29 = sshll.u32 %s157_s28, 3  ;;  %s541_s30 = sshll.u32 %s747_s16, 7 }
  0x12   : > { %s937_s27 = scalar_select %p839_p11, 1, 0 }
  0x13   : > { %s167_s6 = scalar_lea.hbm %s930_s0, %s541_s30  ;;  %s161_s7 = scalar_lea.vmem [#allocation2], %s540_s29 }
  0x14   : > { %s169_s8 = sshll.u32 %s161_s7, 4  ;;  %p852_p0 = pnand %p572_p13, %p822_p4  ;;  %s170_s8 = int_to_ptr.vmem [resolvable:$true] %s169_s8 }
  0x15   : > { %p542_p1 = scmp.ge.s32.totalorder %s751_s17, 1  ;;  %p187_p2 = scmp.lt.s32.totalorder %s751_s17, 3 }
  0x16   : > { %s158_s10 = scalar_lea.sflag [#allocation3], %s157_s28  ;;  %p645_p3 = pneg %p852_p0 }
  0x17   : > { %s656_s11 = scalar_lea.vmem %s170_s8, 128  ;;  %s753_s18 = smov [#allocation2]  }
  0x18   : > { %p657_p5 = scmp.ne.s32.totalorder %s170_s8, %s656_s11  ;;  %s661_s19 = sshll.u32 %s753_s18, 4  ;;  %s662_s19 = int_to_ptr.vmem [resolvable:$false] %s661_s19 }
  0x19   : > { %s663_s21 = scalar_lea.vmem %s662_s19, 256  ;;  %p664_p10 = scmp.lt.s32.totalorder %s170_s8, %s662_s19 }
  0x1a   : > { %p659_p6 = pnand %p657_p5, %p645_p3  ;;  %p665_p12 = scmp.lt.s32.totalorder %s663_s21, %s656_s11 }
  0x1c   : > { %p660_p7 = pneg %p659_p6  ;;  %p666_p4 = por %p665_p12, %p664_p10 }
  0x1e   : > { %p667_p13 = pnand %p666_p4, %p660_p7 }
  0x20   : > { %670 = shalt.err (!%p667_p13)
}
  0x21   : > { %567 = dma.hbm_to_vmem [thread:$0]  (!%p852_p0), %s167_s6, 128, %s170_s8, %s158_s10  }
  0x22   : > { %p188_p11 = pnand %p542_p1, %p187_p2 }
  0x23   : > { %s867_s22 = sand.u32 (!%p188_p11), 1, %s735_s13  }
  0x24   : > { %191 = sbr.rel (%p188_p11) target bundleno = 562 (0x232), region = 32  ;;  %s543_s23 = sshll.u32 (!%p188_p11), %s867_s22, 3 }
  0x25   : > { %s194_s28 = scalar_lea.sflag (!%p188_p11), [#allocation3], %s867_s22  ;;  %s197_s29 = scalar_lea.vmem (!%p188_p11), [#allocation2], %s543_s23 }
  0x29   : > { %722 = dma.done.wait (%p828_p8), %s194_s28, 128  }
  0x2a   : > { %724 = vsyncadd (%p828_p8), %s194_s28, 4294967168  ;;  %p226_p12 = scmp.lt.s32.totalorder %s743_s15, 1  ;;  %v754_v0 = vmov 0.0   ;;  %vm755_vm0 = vmmov 0   ;;  %v756_v1 = vmov 0   ;;  %vm235_vm1 = vcmask 261120  }
  0x2b   : > { %555 = vmatprep.subr.mxu0 %v754_v0  ;;  %557 = vmatprep.mubr.msk.f32.mxu0 %vm755_vm0, %v754_v0  ;;  %v233_v2 = vld [vmem:[%s197_s29] sm:$0xff]  ;;  %v757_v7 = vmov 2   ;;  %v758_v8 = vmov 1   ;;  %v759_v9 = vmov 3   ;;  %v320_v10 = vlaneseq  ;;  %s550_s10 = sshll.u32 %s743_s15, 4  ;;  %s225_s11 = scalar_lea.vmem [#allocation5], %s867_s22 }
  0x2c   : > { %s227_s30 = scalar_select %p226_p12, %s743_s15, 1  ;;  %628 = vset.pattern.permute.xlu0 %v756_v1  ;;  %556 = vmatpush3.xpose.msk.msra.mxu0 %vm235_vm1, %v233_v2  ;;  %v312_v5 = vmul.f32 %v233_v2, %v233_v2  ;;  %vm423_vm2 = vcmask 57344  }
  0x2d   : > { %v883_v12 = vshrl.u32 %v320_v10, 7  ;;  %v417_v59 = vand.u32 127, %v320_v10  ;;  %s439_s18 = sshll.u32 %s225_s11, 4  ;;  %s437_s23 = scalar_lea.hbm %s933_s3, %s550_s10  ;;  %s440_s18 = int_to_ptr.vmem [resolvable:$true] %s439_s18 }
  0x2e   : > { %s544_s4 = sshll.u32 %s227_s30, 2  ;;  %s232_s7 = scalar_lea.vmem %s932_s2, %s227_s30  ;;  %v313_v6 = vsel %vm235_vm1, %v312_v5, 0.0 }
  0x2f   : > { %s229_s24 = scalar_lea.vmem %s931_s1, %s544_s4  ;;  %v331_v3 = vld [vmem:[%s232_s7] sm:$0x1]  ;;  %314 = vadd.xlane.f32.xlu1 %v313_v6  ;;  %v339_v13 = vsub.s32 0, %v883_v12  ;;  %v322_v19 = vsub.s32 2, %v883_v12  ;;  %v381_v30 = vsub.s32 1, %v883_v12  ;;  %v420_v60 = vsub.s32 %v417_v59, %v883_v12  ;;  %s426_s28 = scalar_lea.sflag [#allocation4], %s867_s22 }
  0x30   : > { %v234_v4 = vld [vmem:[%s229_s24] sm:$0x7]  ;;  %334 = vperm.xlu0 %628, %v331_v3   ;;  %s671_s29 = scalar_lea.vmem %s440_s18, 16  ;;  %s760_s30 = smov [#allocation5]  }
  0x31   : > { %558 = vmatmul.mubr.msk.f32.vlgmr.msra.gmra.mxu0 %vm235_vm1, %v234_v4  ;;  %p672_p8 = scmp.ne.s32.totalorder %s440_s18, %s671_s29  ;;  %s675_s4 = sshll.u32 %s760_s30, 4  ;;  %s676_s4 = int_to_ptr.vmem [resolvable:$false] %s675_s4 }
  0x32   : > { %s677_s15 = scalar_lea.vmem %s676_s4, 32  ;;  %p678_p1 = scmp.lt.s32.totalorder %s440_s18, %s676_s4 }
  0x33   : > { %p673_p11 = pnand %p672_p8, %p832_p9  ;;  %p679_p2 = scmp.lt.s32.totalorder %s677_s15, %s671_s29 }
  0x34   : > { %629 = vset.pattern.permute.xlu0 %v757_v7 }
  0x35   : > { %366 = vperm.xlu0 %629, %v331_v3   ;;  %p674_p0 = pneg %p673_p11  ;;  %p680_p3 = por %p679_p2, %p678_p1 }
  0x37   : > { %p681_p5 = pnand %p680_p3, %p674_p0 }
  0x39   : > { %630 = vset.pattern.permute.xlu0 %v758_v8 }
  0x3a   : > { %357 = vperm.xlu0 %630, %v331_v3  }
  0x3e   : > { %631 = vset.pattern.permute.xlu0 %v759_v9 }
  0x3f   : > { %389 = vperm.xlu0 %631, %v331_v3  }
  0x43   : > { %632 = vset.pattern.permute.xlu0 %v756_v1 }
  0xab   : > { %v335_v11 = vpop.permute.xlu0 %334 }
  0xac   : > { %v340_v15 = vrot.slane %v335_v11, %v339_v13 }
  0xb0   : > { %v367_v14 = vpop.permute.xlu0 %366 }
  0xb1   : > { %v372_v16 = vrot.slane %v367_v14, %v339_v13 }
  0xb5   : > { %v358_v37 = vpop.permute.xlu0 %357 }
  0xb6   : > { %v363_v40 = vrot.slane %v358_v37, %v339_v13 }
  0xb8   : > { %v315_v32 = vpop.xlane.xlu1 %314 }
  0xb9   : > { %v317_v33 = vmul.f32 0.03125, %v315_v32 }
  0xba   : > { %v390_v39 = vpop.permute.xlu0 %389 }
  0xbb   : > { %v395_v41 = vrot.slane %v390_v39, %v339_v13 }
  0xf1   : > { %v308_v17 = vpop.f32.mrf.mxu0 }
  0xf2   : > { %v316_v18 = vmul.f32 0.03125, %v308_v17 }
  0xf3   : > { %v559_v20 = vpop.f32.mrf.mxu0 }
  0xf4   : > { %v318_v21 = vmul.f32 %v316_v18, %v316_v18  ;;  %v341_v22 = vmul.f32 %v340_v15, %v316_v18  ;;  %v373_v23 = vmul.f32 %v372_v16, %v316_v18 }
  0xf6   : > { %v323_v24 = vrot.slane %v318_v21, %v322_v19  ;;  %v343_v25 = vrot.slane %v341_v22, 2  ;;  %v375_v26 = vrot.slane %v373_v23, 1 }
  0xf8   : > { %325 = vbcast.lane.b32.xlu1 %v323_v24, 256  ;;  %v345_v27 = vsub.f32 %v308_v17, %v343_v25  ;;  %v377_v29 = vsub.f32 %v308_v17, %v375_v26 }
  0xfa   : > { %v350_v28 = vrot.slane %v345_v27, %v339_v13  ;;  %v382_v31 = vrot.slane %v377_v29, %v381_v30 }
  0xfc   : > { %352 = vbcast.lane.b32.xlu1 %v350_v28, 256 }
 0x100   : > { %384 = vbcast.lane.b32.xlu1 %v382_v31, 256 }
 0x16a   : > { %v326_v34 = vpop.permute.xlu1 %325 }
 0x16b   : > { %v328_v35 = vsub.f32 %v317_v33, %v326_v34 }
 0x16d   : > { %v329_v36 = vadd.f32 1e-05, %v328_v35 }
 0x16e   : > { %v353_v38 = vpop.permute.xlu1 %352 }
 0x16f   : > { %633 = vrsqrt.f32 %v329_v36 }
 0x172   : > { %v385_v43 = vpop.permute.xlu1 %384 }
 0x17c   : > { %v634_v42 = vpop.eup %633 }
 0x17d   : > { %v355_v44 = vmul.f32 %v634_v42, %v353_v38  ;;  %v387_v45 = vmul.f32 %v634_v42, %v385_v43 }
 0x17f   : > { %v364_v46 = vadd.f32 %v363_v40, %v355_v44  ;;  %v396_v47 = vadd.f32 %v395_v41, %v387_v45 }
 0x181   : > { %v547_v48 = vadd.f32 -0.29514, %v364_v46  ;;  %v549_v49 = vmul.f32 -1.442695, %v396_v47 }
 0x183   : > { %v548_v50 = vmul.f32 -25.0, %v547_v48  ;;  %635 = vpow2.f32 %v549_v49 }
 0x185   : > { %v400_v51 = vmul.f32 1.442695, %v548_v50 }
 0x187   : > { %637 = vpow2.f32 %v400_v51 }
 0x190   : > { %v636_v52 = vpop.eup %635 }
 0x191   : > { %v408_v53 = vadd.f32 1.0, %v636_v52 }
 0x193   : > { %639 = vrcp.f32 %v408_v53 }
 0x194   : > { %v638_v54 = vpop.eup %637 }
 0x195   : > { %v402_v55 = vadd.f32 1.0, %v638_v54 }
 0x197   : > { %641 = vrcp.f32 %v402_v55 }
 0x1a0   : > { %v640_v56 = vpop.eup %639 }
 0x1a4   : > { %v642_v57 = vpop.eup %641 }
 0x1a5   : > { %v411_v58 = vmul.f32 %v642_v57, %v640_v56 }
 0x1a7   : > { %414 = vperm.xlu0 %632, %v411_v58  }
 0x222   : > { %v415_v61 = vpop.permute.xlu0 %414 }
 0x223   : > { %v421_v62 = vrot.slane %v415_v61, %v420_v60 }
 0x225   : > { %424 = vst.msk [vmem:[%s225_s11] sm:$0x1] %vm423_vm2, %v421_v62 }
 0x226   : > { %684 = shalt.err (!%p681_p5)
}
 0x227   : > { %s685_s5 = scalar_lea.hbm %s437_s23, 16  ;;  %s689_s7 = scalar_lea.hbm %s933_s3, 32 }
 0x228   : > { %p686_p6 = scmp.ne.s32.totalorder %s437_s23, %s685_s5  ;;  %p690_p4 = scmp.lt.s32.totalorder %s437_s23, %s933_s3 }
 0x229   : > { %p691_p13 = scmp.lt.s32.totalorder %s689_s7, %s685_s5 }
 0x22a   : > { %p687_p7 = pnand %p686_p6, %p832_p9 }
 0x22b   : > { %p692_p12 = por %p691_p13, %p690_p4 }
 0x22c   : > { %p688_p10 = pneg %p687_p7 }
 0x22e   : > { %p693_p8 = pnand %p692_p12, %p688_p10 }
 0x230   : > { %696 = shalt.err (!%p693_p8)
}
 0x231   : > { %562 = dma.vmem_to_hbm [thread:$0]  (%p832_p9), %s440_s18, 16, %s437_s23, %s426_s28  }
 0x232 PF: > { %s451_s24 = sand.u32 1, %s731_s12   ;;  %p939_p11 = scmp.ne.s32.totalorder %s937_s27, 0 }
 0x233   : > { %p940_p0 = scmp.ge.s32.totalorder %s751_s17, 2  ;;  %s452_s10 = scalar_lea.sflag [#allocation4], %s451_s24 }
 0x235   : > { %p569_p1 = pnand %p940_p0, %p939_p11 }
 0x237   : > { %p570_p2 = pneg %p569_p1 }
 0x239   : > { %726 = dma.done.wait (%p570_p2), %s452_s10, 16  }
 0x23a   : > { %728 = vsyncadd (%p570_p2), %s452_s10, 4294967280  ;;  %s19_s17 = sadd.s32 1, %s751_s17   ;;  %s941_s12 = smov %s735_s13 }
 0x23b   : > { %p16_p3 = scmp.ge.s32.totalorder %s19_s17, 4   ;;  %s942_s13 = smov %s739_s14 }
 0x23c   : > { %s943_s14 = smov %s837_s26  ;;  %s944_s15 = smov %s747_s16 }
 0x23d   : > { %s945_s16 = smov %s947_s20  ;;  %18 = sbr.rel (!%p16_p3) target bundleno = 6 (0x6), region = 83 }
 0x242   :  { %456 = vsyncpa [#allocation3], 1 }
 0x243   :  { %458 = vsyncpa [#allocation3 + $0x1], 1 }
 0x244   :  { %459 = vsyncpa [#allocation4], 1 }
 0x245   :  { %461 = vsyncpa [#allocation4 + $0x1], 1 }

</bundles_post_ra>
